<compile_context>
chip_gen: v5e
topology: v5e:2x2
jax: 0.10.0
libtpu: 0.0.40
codegen_flags: <defaults>
</compile_context>

<pallas_src>
import jax
import jax.numpy as jnp
from jax.experimental import pallas as pl
from jax.experimental.pallas import tpu as pltpu

_LANE = 128


def _daf_add_kernel(x_ref, r_ref, o_ref):
    # Hot path: VPU elementwise add on the current VMEM tile.
    o_ref[...] = x_ref[...] + r_ref[...]


def _plain_add(x, residual, out_dtype, orig_shape):
    return (x.astype(out_dtype) + residual.astype(out_dtype)).reshape(orig_shape)


def daf_forward(
    x,
    residual,
    *,
    target_block_bytes: int = 4 * 1024 * 1024,  # per-input tile (~4 MiB)
    max_cols: int = 2048,                       # lane width of the flattened 2-D view
    donate_x: bool = False,                     # alias x -> out (saves an HBM alloc)
    min_pallas_elements: int = 1 << 15,         # below this, plain JAX add is cheaper
):
    """DirectAddFuse forward: returns x + residual (same shape as x)."""
    assert x.shape == residual.shape, "DAF requires matching shapes"
    orig_shape = x.shape
    out_dtype = jnp.promote_types(x.dtype, residual.dtype)

    n = 1
    for d in orig_shape:
        n *= d

    # Tiny inputs: kernel launch + layout plumbing dwarfs the 3 HBM streams.
    if n == 0 or n < min_pallas_elements:
        return _plain_add(x, residual, out_dtype, orig_shape)

    itemsize = jnp.dtype(out_dtype).itemsize
    # Sub-32-bit dtypes pack along sublanes: bf16 needs 16-row tiles, int8 32.
    sublane_min = 8 * max(1, 4 // itemsize)

    # ---- lane-dense 2-D view: cols must be a multiple-of-128 divisor of n ----
    if n % _LANE != 0:
        # No clean lane-dense factorization; padding would cost 2-3x extra HBM
        # passes outside the kernel, so just let XLA do the add.
        return _plain_add(x, residual, out_dtype, orig_shape)

    cols = None
    c = (min(max_cols, n) // _LANE) * _LANE
    while c >= _LANE:
        if n % c == 0:
            if cols is None:
                cols = c  # largest multiple-of-128 divisor so far
            if (n // c) % sublane_min == 0:
                cols = c  # prefer a divisor that also sublane-aligns the rows
                break
        c -= _LANE
    # n % 128 == 0 guarantees cols is at least 128 here.
    rows = n // cols

    # ---- row tiling ----
    single_block = (rows % sublane_min != 0) or (rows < 2 * sublane_min)
    if single_block:
        tile_rows = rows  # block dims == full array dims (allowed by Mosaic)
        if rows * cols * itemsize > 8 * 1024 * 1024:
            # Ragged rows on a large tensor: can't tile without padding, and a
            # single block would blow VMEM.  Fall back to plain XLA add.
            return _plain_add(x, residual, out_dtype, orig_shape)
    else:
        desired = max(
            sublane_min,
            (target_block_bytes // (cols * itemsize)) // sublane_min * sublane_min,
        )
        # Keep the grid >= 2 blocks so DMA pipelining / megacore sharding work.
        cap = max(sublane_min, min(desired, (rows // 2) // sublane_min * sublane_min))
        tile_rows = sublane_min  # always divides rows (rows % sublane_min == 0)
        t = cap
        while t >= sublane_min:
            if rows % t == 0:
                tile_rows = t
                break
            t -= sublane_min

    grid = (rows // tile_rows,)
    tile_bytes = tile_rows * cols * itemsize

    # VMEM budget from the actual tiling: 3 arrays x 2 pipeline buffers + headroom.
    vmem_limit = 3 * 2 * tile_bytes + 2 * 1024 * 1024
    vmem_limit = max(16 * 1024 * 1024, min(vmem_limit, 64 * 1024 * 1024))

    x2 = x.astype(out_dtype).reshape(rows, cols)
    r2 = residual.astype(out_dtype).reshape(rows, cols)

    spec = pl.BlockSpec((tile_rows, cols), lambda i: (i, 0))

    kwargs = {}
    if donate_x:
        # Saves one rows*cols HBM output allocation (bandwidth is unchanged).
        # Note: key 0 indexes kernel operands (num_scalar_prefetch == 0 here).
        kwargs["input_output_aliases"] = {0: 0}

    out2 = pl.pallas_call(
        _daf_add_kernel,
        out_shape=jax.ShapeDtypeStruct((rows, cols), out_dtype),
        grid_spec=pltpu.PrefetchScalarGridSpec(
            num_scalar_prefetch=0,
            grid=grid,
            in_specs=[spec, spec],
            out_specs=spec,
        ),
        compiler_params=pltpu.CompilerParams(
            dimension_semantics=("parallel",),
            vmem_limit_bytes=vmem_limit,
        ),
        cost_estimate=pl.CostEstimate(
            flops=n,
            transcendentals=0,
            bytes_accessed=3 * n * itemsize,
        ),
        **kwargs,
    )(x2, r2)

    return out2.reshape(orig_shape)


if __name__ == "__main__":
    key = jax.random.PRNGKey(0)
    kx, kr = jax.random.split(key)
    # NCHW, small shapes consistent with a feature-fusion module.
    x = jax.random.normal(kx, (2, 4, 16, 16), dtype=jnp.float32)
    residual = jax.random.normal(kr, (2, 4, 16, 16), dtype=jnp.float32)

    # Force the Pallas path (the default would fall back to plain JAX for a
    # tensor this tiny).
    out = daf_forward(x, residual, min_pallas_elements=0)
    out = jax.block_until_ready(out)

    # Correctness check against plain JAX reference.
    ref = x + residual
    assert out.shape == ref.shape and out.dtype == ref.dtype
    assert jnp.allclose(out, ref, atol=1e-6, rtol=1e-6)

    # Also exercise a larger, tiled, non-power-of-two-ish shape on the
    # Pallas path (multi-block grid, donated input).
    kx2, kr2 = jax.random.split(kr)
    xb = jax.random.normal(kx2, (2, 24, 56, 56), dtype=jnp.float32)
    rb = jax.random.normal(kr2, (2, 24, 56, 56), dtype=jnp.float32)
    outb = jax.block_until_ready(daf_forward(xb, rb, donate_x=True,
                                             min_pallas_elements=0))
    assert jnp.allclose(outb, xb + rb, atol=1e-6, rtol=1e-6)

    print("KERNEL_OK")
</pallas_src>

<mosaic_0001>
module attributes {stable_mosaic.version = 11 : i64} {
  func.func @_daf_add_kernel(%arg0: i32, %arg1: memref<8x256xf32, #tpu.memory_space<vmem>>, %arg2: memref<8x256xf32, #tpu.memory_space<vmem>>, %arg3: memref<8x256xf32, #tpu.memory_space<vmem>>) attributes {dimension_semantics = [#tpu.dimension_semantics<parallel>], iteration_bounds = array<i64: 1>, scalar_prefetch = 0 : i64, scratch_operands = 0 : i64, tpu.core_type = #tpu.core_type<tc>, window_params = [{transform_indices = @transform_0, window_bounds = array<i64: 8, 256>}, {transform_indices = @transform_1, window_bounds = array<i64: 8, 256>}, {transform_indices = @transform_2, window_bounds = array<i64: 8, 256>}]} {
    %c0 = arith.constant 0 : index
    %c0_0 = arith.constant 0 : index
    %0 = vector.load %arg1[%c0, %c0_0] : memref<8x256xf32, #tpu.memory_space<vmem>>, vector<8x256xf32>
    %c0_1 = arith.constant 0 : index
    %c0_2 = arith.constant 0 : index
    %1 = vector.load %arg2[%c0_1, %c0_2] : memref<8x256xf32, #tpu.memory_space<vmem>>, vector<8x256xf32>
    %2 = arith.addf %0, %1 : vector<8x256xf32>
    %c0_3 = arith.constant 0 : index
    %c0_4 = arith.constant 0 : index
    %3 = vector.load %arg3[%c0_3, %c0_4] : memref<8x256xf32, #tpu.memory_space<vmem>>, vector<8x256xf32>
    tpu.vector_store %arg3[%c0_3, %c0_4], %2 {strides = array<i32>} : memref<8x256xf32, #tpu.memory_space<vmem>>, vector<8x256xf32>,
    return
  }
  func.func @transform_0(%arg0: i32) -> (i32, i32) {
    %c0_i32 = arith.constant 0 : i32
    %c0_i32_0 = arith.constant 0 : i32
    return %arg0, %c0_i32 : i32, i32
  }
  func.func @transform_1(%arg0: i32) -> (i32, i32) {
    %c0_i32 = arith.constant 0 : i32
    %c0_i32_0 = arith.constant 0 : i32
    return %arg0, %c0_i32 : i32, i32
  }
  func.func @transform_2(%arg0: i32) -> (i32, i32) {
    %c0_i32 = arith.constant 0 : i32
    %c0_i32_0 = arith.constant 0 : i32
    return %arg0, %c0_i32 : i32, i32
  }
}

</mosaic_0001>

<bundles_post_ra>
// kernel: tpu_custom_call.1
= control target key start
LH: loop header
LB: loop body
LE: loop exit
PB: predicated region body
PF: predicated region fallthrough
CT: control target
= control target key end

     0   :  { %7 = vsyncpa [#allocation3], 0  ;;  %s174_s0 = inlined_call_operand.hbm [shape: f32[8,256], index: 0, kind: input, shape index: {}]   ;;  %s175_s1 = inlined_call_operand.hbm [shape: f32[8,256], index: 1, kind: input, shape index: {}]   ;;  %s176_s2 = inlined_call_operand.hbm [shape: f32[8,256], index: 2, kind: output, shape index: {}]  }
   0x1   :  { %8 = vsyncpa [#allocation6], 0 }
   0x2   :  { %9 = vsyncpa [#allocation4], 0  ;;  %s15_s11 = sshll.u32 %s174_s0, 4  ;;  %s147_s12 = smov [#allocation2]   ;;  %s16_s11 = int_to_ptr.hbm [resolvable:$true] %s15_s11 }
   0x3   :  { %s17_s13 = sshll.u32 %s147_s12, 4  ;;  %s26_s16 = sshll.u32 %s175_s1, 4  ;;  %s18_s13 = int_to_ptr.vmem [resolvable:$true] %s17_s13  ;;  %s27_s16 = int_to_ptr.hbm [resolvable:$true] %s26_s16 }
   0x4   :  { %20 = dma.hbm_to_vmem [thread:$0]  %s16_s11, 256, %s18_s13, [#allocation3]  }
   0x5   :  { %s148_s17 = smov [#allocation5]  }
   0x6   :  { %s28_s18 = sshll.u32 %s148_s17, 4  ;;  %s29_s18 = int_to_ptr.vmem [resolvable:$true] %s28_s18 }
   0x7   :  { %31 = dma.hbm_to_vmem [thread:$0]  %s27_s16, 256, %s29_s18, [#allocation6]  }
   0x8   :  { %141 = dma.done.wait [#allocation3], 256  }
   0x9   :  { %142 = vsyncadd [#allocation3], 4294967040 }
   0xa   :  { %143 = dma.done.wait [#allocation6], 256  }
   0xb   :  { %144 = vsyncadd [#allocation6], 4294967040  ;;  %s149_s19 = smov [#allocation7]   ;;  %s55_s22 = sshll.u32 %s176_s2, 4  ;;  %v40_v0 = vld [vmem:[#allocation2] sm:$0xff]  ;;  %v42_v1 = vld [vmem:[#allocation5] sm:$0xff]  ;;  %s56_s22 = int_to_ptr.hbm [resolvable:$true] %s55_s22 }
   0xc   :  { %s53_s0 = sshll.u32 %s149_s19, 4  ;;  %v41_v2 = vld [vmem:[#allocation2 + $0x8] sm:$0xff]  ;;  %v44_v3 = vadd.f32 %v42_v1, %v40_v0  ;;  %v43_v4 = vld [vmem:[#allocation5 + $0x8] sm:$0xff]  ;;  %s54_s0 = int_to_ptr.vmem [resolvable:$true] %s53_s0 }
   0xd   :  { %v45_v5 = vadd.f32 %v43_v4, %v41_v2 }
   0xe   :  { %46 = vst [vmem:[#allocation7] sm:$0xff] %v44_v3 }
   0xf   :  { %47 = vst [vmem:[#allocation7 + $0x8] sm:$0xff] %v45_v5 }
  0x10   :  { %58 = dma.vmem_to_hbm [thread:$0]  %s54_s0, 256, %s56_s22, [#allocation4]  }
  0x11   :  { %145 = dma.done.wait [#allocation4], 256  }
  0x12   :  { %146 = vsyncadd [#allocation4], 4294967040 }
  0x13   :  { %63 = vsyncpa [#allocation3], 1 }
  0x14   :  { %64 = vsyncpa [#allocation6], 1 }
  0x15   :  { %65 = vsyncpa [#allocation4], 1 }

</bundles_post_ra>
